<compile_context>
chip_gen: v7x
topology: tpu7x:2x2x1
jax: 0.10.0
libtpu: 0.0.40
codegen_flags: <defaults>
</compile_context>

<pallas_src>
import math
import numpy as np
import jax
import jax.numpy as jnp
from jax.experimental import pallas as pl
from jax.experimental.pallas import tpu as pltpu

RNN = 64   # rnn_size
INP = 64   # input_size (embedding dim)


# ----------------------------------------------------------------------------
# Kernel factory: one grid step = one chunk of C time steps.
# ----------------------------------------------------------------------------
def _make_kernel(C, B, rnn):
    def kernel(x_ref, wih_ref, whh_ref, b_ref, fcw_ref, fcb_ref,
               out_ref, h_scr, c_scr):
        # Zero the recurrent state on the first chunk only.
        @pl.when(pl.program_id(0) == 0)
        def _():
            h_scr[...] = jnp.zeros_like(h_scr)
            c_scr[...] = jnp.zeros_like(c_scr)

        # Input contribution of every step in this chunk: one lane-dense
        # bf16 matmul, bias added once (hoisted out of the time loop).
        xw = (jnp.dot(x_ref[...], wih_ref[...],
                      preferred_element_type=jnp.float32)
              + b_ref[...])                                  # (C*B, 4*RNN) f32
        whh = whh_ref[...]                                   # (RNN, 4*RNN) bf16

        h = h_scr[...]                                       # (B, RNN) f32
        c = c_scr[...]

        hs = []
        # Small static trip count (C = 4..8): unrolled chunk; the chunk/grid
        # boundary bounds live ranges, so no full-T unroll ever happens.
        for t in range(C):
            gates = xw[t * B:(t + 1) * B, :] + jnp.dot(
                h.astype(whh.dtype), whh,
                preferred_element_type=jnp.float32)          # (B, 4*RNN) f32
            # PyTorch LSTMCell gate order: i, f, g, o.  Transcendentals on the
            # full gate tensor (EUP has slack); slices feed only VPU muls.
            sg = jax.nn.sigmoid(gates)
            tg = jnp.tanh(gates)
            c = sg[:, rnn:2 * rnn] * c + sg[:, 0:rnn] * tg[:, 2 * rnn:3 * rnn]
            h = sg[:, 3 * rnn:4 * rnn] * jnp.tanh(c)
            hs.append(h)

        h_scr[...] = h
        c_scr[...] = c

        # fc_out + log_softmax for this chunk; h_t never round-trip VMEM.
        h_chunk = jnp.concatenate(hs, axis=0)                # (C*B, RNN) f32
        logits = (jnp.dot(h_chunk.astype(fcw_ref.dtype), fcw_ref[...],
                          preferred_element_type=jnp.float32)
                  + fcb_ref[...])                            # (C*B, Vpad) f32
        m = jnp.max(logits, axis=-1, keepdims=True)
        s = logits - m
        lse = jnp.log(jnp.sum(jnp.exp(s), axis=-1, keepdims=True))
        out_ref[...] = s - lse
    return kernel


# ----------------------------------------------------------------------------
# Jitted device wrapper (cached per (T, B, vocab) shape combination).
# ----------------------------------------------------------------------------
@jax.jit
def _inst_lm_device(toks, embed, w_ih, w_hh, b_ih, b_hh, fc_w, fc_b):
    T, B = toks.shape
    vp1, inp = embed.shape
    rnn = w_hh.shape[1]
    vpad = ((vp1 + 127) // 128) * 128

    # Time-steps per grid iteration: smallest C >= 4 with C*B a multiple of 8
    # (keeps every block sublane-tile aligned).
    base = 8 // math.gcd(B, 8)
    C = -(-4 // base) * base
    num_chunks = -(-T // C)
    Tpad = num_chunks * C

    # Pad the token sequence (token id 0 is a valid embedding row); padded
    # steps run after the real ones and their outputs are sliced off below.
    toks_pad = jnp.pad(toks, ((0, Tpad - T), (0, 0)))

    # Embedding gather outside the kernel (no one-hot matmul); bf16 activations
    # and weights on the MXU, f32 accumulation + f32 biases/output in-kernel.
    x_all = jnp.take(embed, toks_pad.reshape(-1), axis=0).astype(jnp.bfloat16)
    wih_cat = w_ih.T.astype(jnp.bfloat16)                    # (INP, 4*RNN)
    whh_cat = w_hh.T.astype(jnp.bfloat16)                    # (RNN, 4*RNN)
    b_cat = (b_ih + b_hh).reshape(1, 4 * rnn)                # (1, 4*RNN) f32

    # fc_out, lane-dense padded to vpad; padded logits biased to -1e30 (f32
    # path, no overflow) and sliced off host-side.
    fcw_pad = jnp.pad(fc_w.T, ((0, 0), (0, vpad - vp1))).astype(jnp.bfloat16)
    fcb_pad = jnp.pad(fc_b.reshape(1, vp1), ((0, 0), (0, vpad - vp1)),
                      constant_values=-1e30)                 # (1, Vpad) f32

    # Explicit VMEM budget (double-buffered per-chunk blocks + weights) so the
    # same code stays inside v5e's 16 MiB scoped default and v7x's 64 MiB.
    x_blk = C * B * inp * 2
    out_blk = C * B * vpad * 4
    weights = ((inp * 4 * rnn + rnn * 4 * rnn + rnn * vpad) * 2
               + (4 * rnn + vpad) * 4)
    scratch = 2 * B * rnn * 4
    vmem_need = 2 * (x_blk + out_blk) + weights + scratch
    vmem_limit = int(min(max(4 * vmem_need, 4 << 20), 48 << 20))

    out_flat = pl.pallas_call(
        _make_kernel(C, B, rnn),
        out_shape=jax.ShapeDtypeStruct((Tpad * B, vpad), jnp.float32),
        grid_spec=pltpu.PrefetchScalarGridSpec(
            num_scalar_prefetch=0,
            grid=(num_chunks,),
            in_specs=[
                pl.BlockSpec((C * B, inp), lambda j: (j, 0)),     # x chunk
                pl.BlockSpec((inp, 4 * rnn), lambda j: (0, 0)),   # W_ih^T cat
                pl.BlockSpec((rnn, 4 * rnn), lambda j: (0, 0)),   # W_hh^T cat
                pl.BlockSpec((1, 4 * rnn), lambda j: (0, 0)),     # gate bias
                pl.BlockSpec((rnn, vpad), lambda j: (0, 0)),      # fc W^T pad
                pl.BlockSpec((1, vpad), lambda j: (0, 0)),        # fc b pad
            ],
            out_specs=pl.BlockSpec((C * B, vpad), lambda j: (j, 0)),
            scratch_shapes=[
                pltpu.VMEM((B, rnn), jnp.float32),   # h carried across chunks
                pltpu.VMEM((B, rnn), jnp.float32),   # c carried across chunks
            ],
        ),
        compiler_params=pltpu.CompilerParams(
            dimension_semantics=("arbitrary",),   # serial carry across chunks
            vmem_limit_bytes=vmem_limit),
    )(x_all, wih_cat, whh_cat, b_cat, fcw_pad, fcb_pad)

    # (Tpad*B, Vpad) -> (B, T, V+1)  == torch.cat([o.unsqueeze(1) ...], 1)
    out = out_flat.reshape(Tpad, B, vpad)[:T, :, :vp1]
    return jnp.transpose(out, (1, 0, 2))


# ----------------------------------------------------------------------------
# Parameter setup (deterministic, matches nn.Module __init__ shapes)
# ----------------------------------------------------------------------------
def init_params(key, vocab_size):
    vp1 = vocab_size + 1
    ks = jax.random.split(key, 7)
    sc = 0.1
    return {
        "embed": jax.random.normal(ks[0], (vp1, INP), jnp.float32) * sc,
        "w_ih":  jax.random.normal(ks[1], (4 * RNN, INP), jnp.float32) * sc,
        "w_hh":  jax.random.normal(ks[2], (4 * RNN, RNN), jnp.float32) * sc,
        "b_ih":  jax.random.normal(ks[3], (4 * RNN,), jnp.float32) * sc,
        "b_hh":  jax.random.normal(ks[4], (4 * RNN,), jnp.float32) * sc,
        "fc_w":  jax.random.normal(ks[5], (vp1, RNN), jnp.float32) * sc,
        "fc_b":  jax.random.normal(ks[6], (vp1,), jnp.float32) * sc,
    }


def _num_steps(inst_np):
    """Replicates the PyTorch loop's early break (host-side, concrete data).

    PyTorch breaks BEFORE emitting an output for the first i>=1 whose column
    sums to zero, so T equals that i (or S-1 if no such column).
    """
    B, S = inst_np.shape
    T = S - 1
    for i in range(1, S - 1):
        if inst_np[:, i].sum() == 0:
            T = i
            break
    return T


# ----------------------------------------------------------------------------
# Public forward: host-side early-break resolution + device call.
# ----------------------------------------------------------------------------
def inst_lm_forward(inst, params):
    inst_np = np.asarray(inst).astype(np.int32)
    T = _num_steps(inst_np)
    toks = jnp.asarray(inst_np[:, :T].T)   # (T, B), time-major token ids
    return _inst_lm_device(toks, params["embed"], params["w_ih"],
                           params["w_hh"], params["b_ih"], params["b_hh"],
                           params["fc_w"], params["fc_b"])


# ----------------------------------------------------------------------------
# Pure-JAX reference (mirrors the PyTorch forward) for correctness checking
# ----------------------------------------------------------------------------
def inst_lm_reference(inst, params):
    inst_np = np.asarray(inst).astype(np.int32)
    B, S = inst_np.shape
    T = _num_steps(inst_np)
    h = jnp.zeros((B, RNN), jnp.float32)
    c = jnp.zeros((B, RNN), jnp.float32)
    outs = []
    for i in range(T):
        xt = params["embed"][inst_np[:, i]]
        gates = (xt @ params["w_ih"].T + params["b_ih"]
                 + h @ params["w_hh"].T + params["b_hh"])
        i_g = jax.nn.sigmoid(gates[:, 0:RNN])
        f_g = jax.nn.sigmoid(gates[:, RNN:2 * RNN])
        g_g = jnp.tanh(gates[:, 2 * RNN:3 * RNN])
        o_g = jax.nn.sigmoid(gates[:, 3 * RNN:4 * RNN])
        c = f_g * c + i_g * g_g
        h = o_g * jnp.tanh(c)
        logits = h @ params["fc_w"].T + params["fc_b"]
        outs.append(jax.nn.log_softmax(logits, axis=1))
    return jnp.stack(outs, axis=1)


if __name__ == "__main__":
    vocab_size = 32
    B, S = 4, 8

    key = jax.random.PRNGKey(0)
    k_par, k_tok = jax.random.split(key)
    params = init_params(k_par, vocab_size)

    # Token ids in [1, vocab_size] so no all-zero column triggers early break.
    inst = jax.random.randint(k_tok, (B, S), 1, vocab_size + 1, dtype=jnp.int32)

    out = inst_lm_forward(inst, params)
    out = jax.block_until_ready(out)

    ref = inst_lm_reference(inst, params)
    # bf16 MXU inputs with f32 accumulation -> loosened tolerance vs. f32 ref.
    np.testing.assert_allclose(np.asarray(out), np.asarray(ref),
                               rtol=2e-2, atol=2e-2)
    print("KERNEL_OK")
</pallas_src>

<mosaic_0001>
module attributes {stable_mosaic.version = 11 : i64} {
  func.func @kernel(%arg0: i32, %arg1: memref<16x64xbf16, #tpu.memory_space<vmem>>, %arg2: memref<64x256xbf16, #tpu.memory_space<vmem>>, %arg3: memref<64x256xbf16, #tpu.memory_space<vmem>>, %arg4: memref<1x256xf32, #tpu.memory_space<vmem>>, %arg5: memref<64x128xbf16, #tpu.memory_space<vmem>>, %arg6: memref<1x128xf32, #tpu.memory_space<vmem>>, %arg7: memref<16x128xf32, #tpu.memory_space<vmem>>, %arg8: memref<4x64xf32, #tpu.memory_space<vmem>>, %arg9: memref<4x64xf32, #tpu.memory_space<vmem>>) attributes {dimension_semantics = [#tpu.dimension_semantics<arbitrary>], iteration_bounds = array<i64: 2>, scalar_prefetch = 0 : i64, scratch_operands = 2 : i64, tpu.core_type = #tpu.core_type<tc>, window_params = [{transform_indices = @transform_0, window_bounds = array<i64: 16, 64>}, {pipeline_mode = #tpu.pipeline_mode<synchronous>, transform_indices = @transform_1, window_bounds = array<i64: 64, 256>}, {pipeline_mode = #tpu.pipeline_mode<synchronous>, transform_indices = @transform_2, window_bounds = array<i64: 64, 256>}, {pipeline_mode = #tpu.pipeline_mode<synchronous>, transform_indices = @transform_3, window_bounds = array<i64: 1, 256>}, {pipeline_mode = #tpu.pipeline_mode<synchronous>, transform_indices = @transform_4, window_bounds = array<i64: 64, 128>}, {pipeline_mode = #tpu.pipeline_mode<synchronous>, transform_indices = @transform_5, window_bounds = array<i64: 1, 128>}, {transform_indices = @transform_6, window_bounds = array<i64: 16, 128>}]} {
    %c0_i32 = arith.constant 0 : i32
    %0 = arith.cmpi eq, %arg0, %c0_i32 : i32
    %1 = arith.extui %0 : i1 to i32
    %c0_i32_0 = arith.constant 0 : i32
    %2 = arith.cmpi ne, %1, %c0_i32_0 : i32
    scf.if %2 {
      %cst_33 = arith.constant 0.000000e+00 : f32
      %108 = vector.broadcast %cst_33 : f32 to vector<4x64xf32>
      %c0_34 = arith.constant 0 : index
      %c0_35 = arith.constant 0 : index
      %109 = vector.load %arg8[%c0_34, %c0_35] : memref<4x64xf32, #tpu.memory_space<vmem>>, vector<4x64xf32>
      tpu.vector_store %arg8[%c0_34, %c0_35], %108 {strides = array<i32>} : memref<4x64xf32, #tpu.memory_space<vmem>>, vector<4x64xf32>,
      %cst_36 = arith.constant 0.000000e+00 : f32
      %110 = vector.broadcast %cst_36 : f32 to vector<4x64xf32>
      %c0_37 = arith.constant 0 : index
      %c0_38 = arith.constant 0 : index
      %111 = vector.load %arg9[%c0_37, %c0_38] : memref<4x64xf32, #tpu.memory_space<vmem>>, vector<4x64xf32>
      tpu.vector_store %arg9[%c0_37, %c0_38], %110 {strides = array<i32>} : memref<4x64xf32, #tpu.memory_space<vmem>>, vector<4x64xf32>,
    } else {
    }
    %c0 = arith.constant 0 : index
    %c0_1 = arith.constant 0 : index
    %3 = vector.load %arg1[%c0, %c0_1] : memref<16x64xbf16, #tpu.memory_space<vmem>>, vector<16x64xbf16>
    %c0_2 = arith.constant 0 : index
    %c0_3 = arith.constant 0 : index
    %4 = vector.load %arg2[%c0_2, %c0_3] : memref<64x256xbf16, #tpu.memory_space<vmem>>, vector<64x256xbf16>
    %cst = arith.constant dense<0.000000e+00> : vector<16x256xf32>
    %5 = tpu.matmul %3, %4, %cst {dimension_numbers = #tpu.dot_dimension_numbers<[1], [0], [0], [1], [0, 0, 1, 1], [], []>} : vector<16x64xbf16>, vector<64x256xbf16>, vector<16x256xf32> -> vector<16x256xf32>
    %c0_4 = arith.constant 0 : index
    %c0_5 = arith.constant 0 : index
    %6 = vector.load %arg4[%c0_4, %c0_5] : memref<1x256xf32, #tpu.memory_space<vmem>>, vector<1x256xf32>
    %7 = vector.broadcast %6 : vector<1x256xf32> to vector<16x256xf32>
    %8 = arith.addf %5, %7 : vector<16x256xf32>
    %c0_6 = arith.constant 0 : index
    %c0_7 = arith.constant 0 : index
    %9 = vector.load %arg3[%c0_6, %c0_7] : memref<64x256xbf16, #tpu.memory_space<vmem>>, vector<64x256xbf16>
    %c0_8 = arith.constant 0 : index
    %c0_9 = arith.constant 0 : index
    %10 = vector.load %arg8[%c0_8, %c0_9] : memref<4x64xf32, #tpu.memory_space<vmem>>, vector<4x64xf32>
    %c0_10 = arith.constant 0 : index
    %c0_11 = arith.constant 0 : index
    %11 = vector.load %arg9[%c0_10, %c0_11] : memref<4x64xf32, #tpu.memory_space<vmem>>, vector<4x64xf32>
    %12 = vector.extract_strided_slice %8 {offsets = [0, 0], sizes = [4, 256], strides = [1, 1]} : vector<16x256xf32> to vector<4x256xf32>
    %13 = arith.truncf %10 : vector<4x64xf32> to vector<4x64xbf16>
    %cst_12 = arith.constant dense<0.000000e+00> : vector<4x256xf32>
    %14 = tpu.matmul %13, %9, %cst_12 {dimension_numbers = #tpu.dot_dimension_numbers<[1], [0], [0], [1], [0, 0, 1, 1], [], []>} : vector<4x64xbf16>, vector<64x256xbf16>, vector<4x256xf32> -> vector<4x256xf32>
    %15 = arith.addf %12, %14 : vector<4x256xf32>
    %16 = arith.negf %15 : vector<4x256xf32>
    %17 = math.exp %16 : vector<4x256xf32>
    %cst_13 = arith.constant 1.000000e+00 : f32
    %18 = vector.broadcast %cst_13 : f32 to vector<4x256xf32>
    %19 = arith.addf %18, %17 : vector<4x256xf32>
    %20 = arith.divf %18, %19 : vector<4x256xf32>
    %21 = math.tanh %15 : vector<4x256xf32>
    %22 = vector.extract_strided_slice %20 {offsets = [0, 64], sizes = [4, 64], strides = [1, 1]} : vector<4x256xf32> to vector<4x64xf32>
    %23 = arith.mulf %22, %11 : vector<4x64xf32>
    %24 = vector.extract_strided_slice %20 {offsets = [0, 0], sizes = [4, 64], strides = [1, 1]} : vector<4x256xf32> to vector<4x64xf32>
    %25 = vector.extract_strided_slice %21 {offsets = [0, 128], sizes = [4, 64], strides = [1, 1]} : vector<4x256xf32> to vector<4x64xf32>
    %26 = arith.mulf %24, %25 : vector<4x64xf32>
    %27 = arith.addf %23, %26 : vector<4x64xf32>
    %28 = vector.extract_strided_slice %20 {offsets = [0, 192], sizes = [4, 64], strides = [1, 1]} : vector<4x256xf32> to vector<4x64xf32>
    %29 = math.tanh %27 : vector<4x64xf32>
    %30 = arith.mulf %28, %29 : vector<4x64xf32>
    %31 = vector.extract_strided_slice %8 {offsets = [4, 0], sizes = [4, 256], strides = [1, 1]} : vector<16x256xf32> to vector<4x256xf32>
    %32 = arith.truncf %30 : vector<4x64xf32> to vector<4x64xbf16>
    %cst_14 = arith.constant dense<0.000000e+00> : vector<4x256xf32>
    %33 = tpu.matmul %32, %9, %cst_14 {dimension_numbers = #tpu.dot_dimension_numbers<[1], [0], [0], [1], [0, 0, 1, 1], [], []>} : vector<4x64xbf16>, vector<64x256xbf16>, vector<4x256xf32> -> vector<4x256xf32>
    %34 = arith.addf %31, %33 : vector<4x256xf32>
    %35 = arith.negf %34 : vector<4x256xf32>
    %36 = math.exp %35 : vector<4x256xf32>
    %cst_15 = arith.constant 1.000000e+00 : f32
    %37 = vector.broadcast %cst_15 : f32 to vector<4x256xf32>
    %38 = arith.addf %37, %36 : vector<4x256xf32>
    %39 = arith.divf %37, %38 : vector<4x256xf32>
    %40 = math.tanh %34 : vector<4x256xf32>
    %41 = vector.extract_strided_slice %39 {offsets = [0, 64], sizes = [4, 64], strides = [1, 1]} : vector<4x256xf32> to vector<4x64xf32>
    %42 = arith.mulf %41, %27 : vector<4x64xf32>
    %43 = vector.extract_strided_slice %39 {offsets = [0, 0], sizes = [4, 64], strides = [1, 1]} : vector<4x256xf32> to vector<4x64xf32>
    %44 = vector.extract_strided_slice %40 {offsets = [0, 128], sizes = [4, 64], strides = [1, 1]} : vector<4x256xf32> to vector<4x64xf32>
    %45 = arith.mulf %43, %44 : vector<4x64xf32>
    %46 = arith.addf %42, %45 : vector<4x64xf32>
    %47 = vector.extract_strided_slice %39 {offsets = [0, 192], sizes = [4, 64], strides = [1, 1]} : vector<4x256xf32> to vector<4x64xf32>
    %48 = math.tanh %46 : vector<4x64xf32>
    %49 = arith.mulf %47, %48 : vector<4x64xf32>
    %50 = vector.extract_strided_slice %8 {offsets = [8, 0], sizes = [4, 256], strides = [1, 1]} : vector<16x256xf32> to vector<4x256xf32>
    %51 = arith.truncf %49 : vector<4x64xf32> to vector<4x64xbf16>
    %cst_16 = arith.constant dense<0.000000e+00> : vector<4x256xf32>
    %52 = tpu.matmul %51, %9, %cst_16 {dimension_numbers = #tpu.dot_dimension_numbers<[1], [0], [0], [1], [0, 0, 1, 1], [], []>} : vector<4x64xbf16>, vector<64x256xbf16>, vector<4x256xf32> -> vector<4x256xf32>
    %53 = arith.addf %50, %52 : vector<4x256xf32>
    %54 = arith.negf %53 : vector<4x256xf32>
    %55 = math.exp %54 : vector<4x256xf32>
    %cst_17 = arith.constant 1.000000e+00 : f32
    %56 = vector.broadcast %cst_17 : f32 to vector<4x256xf32>
    %57 = arith.addf %56, %55 : vector<4x256xf32>
    %58 = arith.divf %56, %57 : vector<4x256xf32>
    %59 = math.tanh %53 : vector<4x256xf32>
    %60 = vector.extract_strided_slice %58 {offsets = [0, 64], sizes = [4, 64], strides = [1, 1]} : vector<4x256xf32> to vector<4x64xf32>
    %61 = arith.mulf %60, %46 : vector<4x64xf32>
    %62 = vector.extract_strided_slice %58 {offsets = [0, 0], sizes = [4, 64], strides = [1, 1]} : vector<4x256xf32> to vector<4x64xf32>
    %63 = vector.extract_strided_slice %59 {offsets = [0, 128], sizes = [4, 64], strides = [1, 1]} : vector<4x256xf32> to vector<4x64xf32>
    %64 = arith.mulf %62, %63 : vector<4x64xf32>
    %65 = arith.addf %61, %64 : vector<4x64xf32>
    %66 = vector.extract_strided_slice %58 {offsets = [0, 192], sizes = [4, 64], strides = [1, 1]} : vector<4x256xf32> to vector<4x64xf32>
    %67 = math.tanh %65 : vector<4x64xf32>
    %68 = arith.mulf %66, %67 : vector<4x64xf32>
    %69 = vector.extract_strided_slice %8 {offsets = [12, 0], sizes = [4, 256], strides = [1, 1]} : vector<16x256xf32> to vector<4x256xf32>
    %70 = arith.truncf %68 : vector<4x64xf32> to vector<4x64xbf16>
    %cst_18 = arith.constant dense<0.000000e+00> : vector<4x256xf32>
    %71 = tpu.matmul %70, %9, %cst_18 {dimension_numbers = #tpu.dot_dimension_numbers<[1], [0], [0], [1], [0, 0, 1, 1], [], []>} : vector<4x64xbf16>, vector<64x256xbf16>, vector<4x256xf32> -> vector<4x256xf32>
    %72 = arith.addf %69, %71 : vector<4x256xf32>
    %73 = arith.negf %72 : vector<4x256xf32>
    %74 = math.exp %73 : vector<4x256xf32>
    %cst_19 = arith.constant 1.000000e+00 : f32
    %75 = vector.broadcast %cst_19 : f32 to vector<4x256xf32>
    %76 = arith.addf %75, %74 : vector<4x256xf32>
    %77 = arith.divf %75, %76 : vector<4x256xf32>
    %78 = math.tanh %72 : vector<4x256xf32>
    %79 = vector.extract_strided_slice %77 {offsets = [0, 64], sizes = [4, 64], strides = [1, 1]} : vector<4x256xf32> to vector<4x64xf32>
    %80 = arith.mulf %79, %65 : vector<4x64xf32>
    %81 = vector.extract_strided_slice %77 {offsets = [0, 0], sizes = [4, 64], strides = [1, 1]} : vector<4x256xf32> to vector<4x64xf32>
    %82 = vector.extract_strided_slice %78 {offsets = [0, 128], sizes = [4, 64], strides = [1, 1]} : vector<4x256xf32> to vector<4x64xf32>
    %83 = arith.mulf %81, %82 : vector<4x64xf32>
    %84 = arith.addf %80, %83 : vector<4x64xf32>
    %85 = vector.extract_strided_slice %77 {offsets = [0, 192], sizes = [4, 64], strides = [1, 1]} : vector<4x256xf32> to vector<4x64xf32>
    %86 = math.tanh %84 : vector<4x64xf32>
    %87 = arith.mulf %85, %86 : vector<4x64xf32>
    %c0_20 = arith.constant 0 : index
    %c0_21 = arith.constant 0 : index
    %88 = vector.load %arg8[%c0_20, %c0_21] : memref<4x64xf32, #tpu.memory_space<vmem>>, vector<4x64xf32>
    tpu.vector_store %arg8[%c0_20, %c0_21], %87 {strides = array<i32>} : memref<4x64xf32, #tpu.memory_space<vmem>>, vector<4x64xf32>,
    %c0_22 = arith.constant 0 : index
    %c0_23 = arith.constant 0 : index
    %89 = vector.load %arg9[%c0_22, %c0_23] : memref<4x64xf32, #tpu.memory_space<vmem>>, vector<4x64xf32>
    tpu.vector_store %arg9[%c0_22, %c0_23], %84 {strides = array<i32>} : memref<4x64xf32, #tpu.memory_space<vmem>>, vector<4x64xf32>,
    %90 = tpu.concatenate %30, %49, %68, %87 in 0 : vector<4x64xf32>, vector<4x64xf32>, vector<4x64xf32>, vector<4x64xf32> -> vector<16x64xf32>
    %91 = arith.truncf %90 : vector<16x64xf32> to vector<16x64xbf16>
    %c0_24 = arith.constant 0 : index
    %c0_25 = arith.constant 0 : index
    %92 = vector.load %arg5[%c0_24, %c0_25] : memref<64x128xbf16, #tpu.memory_space<vmem>>, vector<64x128xbf16>
    %cst_26 = arith.constant dense<0.000000e+00> : vector<16x128xf32>
    %93 = tpu.matmul %91, %92, %cst_26 {dimension_numbers = #tpu.dot_dimension_numbers<[1], [0], [0], [1], [0, 0, 1, 1], [], []>} : vector<16x64xbf16>, vector<64x128xbf16>, vector<16x128xf32> -> vector<16x128xf32>
    %c0_27 = arith.constant 0 : index
    %c0_28 = arith.constant 0 : index
    %94 = vector.load %arg6[%c0_27, %c0_28] : memref<1x128xf32, #tpu.memory_space<vmem>>, vector<1x128xf32>
    %95 = vector.broadcast %94 : vector<1x128xf32> to vector<16x128xf32>
    %96 = arith.addf %93, %95 : vector<16x128xf32>
    %cst_29 = arith.constant dense<0xFF800000> : vector<16xf32>
    %97 = vector.multi_reduction <maximumf>, %96, %cst_29 [1] : vector<16x128xf32> to vector<16xf32>
    %98 = vector.shape_cast %97 : vector<16xf32> to vector<16x1xf32>
    %99 = vector.broadcast %98 : vector<16x1xf32> to vector<16x128xf32>
    %100 = arith.subf %96, %99 : vector<16x128xf32>
    %101 = math.exp %100 : vector<16x128xf32>
    %cst_30 = arith.constant dense<0.000000e+00> : vector<16xf32>
    %102 = vector.multi_reduction <add>, %101, %cst_30 [1] : vector<16x128xf32> to vector<16xf32>
    %103 = vector.shape_cast %102 : vector<16xf32> to vector<16x1xf32>
    %104 = math.log %103 : vector<16x1xf32>
    %105 = vector.broadcast %104 : vector<16x1xf32> to vector<16x128xf32>
    %106 = arith.subf %100, %105 : vector<16x128xf32>
    %c0_31 = arith.constant 0 : index
    %c0_32 = arith.constant 0 : index
    %107 = vector.load %arg7[%c0_31, %c0_32] : memref<16x128xf32, #tpu.memory_space<vmem>>, vector<16x128xf32>
    tpu.vector_store %arg7[%c0_31, %c0_32], %106 {strides = array<i32>} : memref<16x128xf32, #tpu.memory_space<vmem>>, vector<16x128xf32>,
    return
  }
  func.func @transform_0(%arg0: i32) -> (i32, i32) {
    %c0_i32 = arith.constant 0 : i32
    %c0_i32_0 = arith.constant 0 : i32
    return %arg0, %c0_i32 : i32, i32
  }
  func.func @transform_1(%arg0: i32) -> (i32, i32) {
    %c0_i32 = arith.constant 0 : i32
    %c0_i32_0 = arith.constant 0 : i32
    %c0_i32_1 = arith.constant 0 : i32
    return %c0_i32, %c0_i32_0 : i32, i32
  }
  func.func @transform_2(%arg0: i32) -> (i32, i32) {
    %c0_i32 = arith.constant 0 : i32
    %c0_i32_0 = arith.constant 0 : i32
    %c0_i32_1 = arith.constant 0 : i32
    return %c0_i32, %c0_i32_0 : i32, i32
  }
  func.func @transform_3(%arg0: i32) -> (i32, i32) {
    %c0_i32 = arith.constant 0 : i32
    %c0_i32_0 = arith.constant 0 : i32
    %c0_i32_1 = arith.constant 0 : i32
    return %c0_i32, %c0_i32_0 : i32, i32
  }
  func.func @transform_4(%arg0: i32) -> (i32, i32) {
    %c0_i32 = arith.constant 0 : i32
    %c0_i32_0 = arith.constant 0 : i32
    %c0_i32_1 = arith.constant 0 : i32
    return %c0_i32, %c0_i32_0 : i32, i32
  }
  func.func @transform_5(%arg0: i32) -> (i32, i32) {
    %c0_i32 = arith.constant 0 : i32
    %c0_i32_0 = arith.constant 0 : i32
    %c0_i32_1 = arith.constant 0 : i32
    return %c0_i32, %c0_i32_0 : i32, i32
  }
  func.func @transform_6(%arg0: i32) -> (i32, i32) {
    %c0_i32 = arith.constant 0 : i32
    %c0_i32_0 = arith.constant 0 : i32
    return %arg0, %c0_i32 : i32, i32
  }
}

</mosaic_0001>

<bundles_post_ra>
// kernel: _inst_lm_device.1
= control target key start
LH: loop header
LB: loop body
LE: loop exit
PB: predicated region body
PF: predicated region fallthrough
CT: control target
= control target key end

     0   :  { %s1128_s21 = smov 0   ;;  %s1300_s0 = inlined_call_operand.vmem [shape: bf16[32,64], index: 0, kind: input, shape index: {}]   ;;  %s1301_s1 = inlined_call_operand.vmem [shape: bf16[64,256], index: 1, kind: input, shape index: {}]   ;;  %s1302_s2 = inlined_call_operand.vmem [shape: bf16[64,256], index: 2, kind: input, shape index: {}]   ;;  %s1303_s3 = inlined_call_operand.vmem [shape: f32[1,256], index: 3, kind: input, shape index: {}]   ;;  %s1304_s4 = inlined_call_operand.vmem [shape: bf16[64,128], index: 4, kind: input, shape index: {}]   ;;  %s1305_s5 = inlined_call_operand.vmem [shape: f32[1,128], index: 5, kind: input, shape index: {}]   ;;  %s1306_s6 = inlined_call_operand.vmem [shape: f32[32,128], index: 6, kind: output, shape index: {}]  }
   0x1 LB: > { %s917_s22 = sadd.s32 4294967295, %s1086_s21   ;;  %p921_p0 = scmp.ge.s32.totalorder %s1086_s21, 1  ;;  %s1086_s21 = sphi %s1128_s21, %s16_s21  }
   0x2   : > { %p213_p1 = scmp.lt.s32.totalorder %s1086_s21, 3 }
   0x4   : > { %p214_p2 = pnand %p921_p0, %p213_p1 }
   0x5   : > { %s922_s23 = sshll.u32 (!%p214_p2), %s917_s22, 1  ;;  %p926_p4 = scmp.ne.s32.totalorder (!%p214_p2), %s917_s22, 0 }
   0x6   : > { %217 = sbr.rel (%p214_p2) target bundleno = 2534 (0x9e6), region = 44  ;;  %p244_p3 = scmp.lt.s32.totalorder (!%p214_p2), %s922_s23, 3 }
   0xd   : > { %s1308_s23 = smov (!%p244_p3, %s922_s23), 3  ;;  %259 = sbr.rel (%p926_p4) target bundleno = 20 (0x14), region = 48 }
   0xe   : > { %s923_s24 = sshll.u32 %s1308_s23, 2  ;;  %s925_s25 = sshll.u32 %s1308_s23, 3  ;;  %vm260_vm0 = vcmask (!%p926_p4), 519168   ;;  %v1088_v0 = vmov (!%p926_p4), 0.0  }
   0xf   : > { %s1139_s28 = scalar_lea.vmem %s1300_s0, %s923_s24  ;;  %s1144_s7 = scalar_lea.vmem %s1306_s6, %s925_s25  ;;  %261 = vst.msk [vmem:[#allocation2] sm:$0xf] (!%p926_p4), %vm260_vm0, %v1088_v0  ;;  %262 = vst.msk [vmem:[#allocation3] sm:$0xf] (!%p926_p4), %vm260_vm0, %v1088_v0 }
  0x14 PF: > { %v995_v1 = vld [vmem:[%s1301_s1 + $0x4] ss:$8 sps:$4 sm:$0xff]   ;;  %v1089_v3 = vmov 0   ;;  %v999_v4 = vld [vmem:[%s1301_s1] ss:$8 sps:$4 sm:$0xff]   ;;  %s1090_s19 = smov 64   ;;  %v275_v22 = vlaneseq }
  0x15   : > { %v997_v2 = vld [vmem:[%s1302_s2 + $0x4] ss:$8 sps:$4 sm:$0xff]   ;;  %366 = vmatprep.mubr.bf16.mxu0 %v1089_v3  ;;  %463 = vmatprep.mubr.bf16.mxu1 %v1089_v3  ;;  %v1160_v5 = vld [vmem:[%s1302_s2] ss:$8 sps:$4 sm:$0xff]   ;;  %v1001_v6 = vld [vmem:[%s1301_s1 + $0x14] ss:$8 sps:$4 sm:$0xff]  }
  0x16   : > { %334 = vmatprep.subr.bf16.mxu0 %v995_v1  ;;  %431 = vmatprep.subr.bf16.mxu1 %v997_v2  ;;  %v1169_v7 = vld [vmem:[%s1302_s2 + $0x14] ss:$8 sps:$4 sm:$0xff]   ;;  %v1005_v8 = vld [vmem:[%s1301_s1 + $0x10] ss:$8 sps:$4 sm:$0xff]   ;;  %v1007_v10 = vld [vmem:[%s1301_s1 + $0x24] ss:$8 sps:$4 sm:$0xff]  }
  0x17   : > { %335 = vmatpush1.bf16.msra.mxu0 %v999_v4  ;;  %432 = vmatpush1.bf16.msra.mxu1 %v1160_v5  ;;  %v1177_v9 = vld [vmem:[%s1302_s2 + $0x10] ss:$8 sps:$4 sm:$0xff]   ;;  %v1186_v11 = vld [vmem:[%s1302_s2 + $0x24] ss:$8 sps:$4 sm:$0xff]   ;;  %v1011_v12 = vld [vmem:[%s1301_s1 + $0x20] ss:$8 sps:$4 sm:$0xff]  }
  0x18   : > { %336 = vmatprep.subr.bf16.mxu0 %v1001_v6  ;;  %433 = vmatprep.subr.bf16.mxu1 %v1169_v7  ;;  %v1194_v13 = vld [vmem:[%s1302_s2 + $0x20] ss:$8 sps:$4 sm:$0xff]   ;;  %v1013_v14 = vld [vmem:[%s1301_s1 + $0x34] ss:$8 sps:$4 sm:$0xff]   ;;  %v1017_v16 = vld [vmem:[%s1301_s1 + $0x30] ss:$8 sps:$4 sm:$0xff]  }
  0x19   : > { %v1204_v15 = vld [vmem:[%s1302_s2 + $0x34] ss:$8 sps:$4 sm:$0xff]   ;;  %v1212_v17 = vld [vmem:[%s1302_s2 + $0x30] ss:$8 sps:$4 sm:$0xff]   ;;  %v385_v18 = vld [vmem:[#allocation2] sm:$0xf] }
  0x1a   : > { %v386_v19 = vld [vmem:[#allocation3] sm:$0xf]  ;;  %v387_v21 = vpack.c.bf16 %v385_v18, %v385_v18  ;;  %vm330_vm1 = vcmask 523264   ;;  %v276_v23 = vshrl.u32 %v275_v22, 7  ;;  %v273_v25 = vld [vmem:[%s1303_s3] sm:$0x3] }
  0x1b   : > { %337 = vmatpush1.bf16.msra.mxu0 %v1005_v8  ;;  %434 = vmatpush1.bf16.msra.mxu1 %v1177_v9  ;;  %v1019_v20 = vld [vmem:[%s1139_s28] sm:$0xff]   ;;  %vm1092_vm2 = vmmov 0   ;;  %vm749_vm3 = vcmask 1043456   ;;  %vm742_vm4 = vcmask 523268  }
  0x1c   : > { %338 = vmatprep.subr.bf16.mxu0 %v1007_v10  ;;  %435 = vmatprep.subr.bf16.mxu1 %v1186_v11  ;;  %v277_v24 = vsub.s32 0, %v276_v23  ;;  %v281_v27 = vsub.s32 1, %v276_v23 }
  0x1d   : > { %488 = vrot.lane.b32.xlu0 %v386_v19, %s1090_s19 }
  0x1e   : > { %v278_v26 = vrot.slane %v273_v25, %v277_v24  ;;  %v282_v33 = vrot.slane %v273_v25, %v281_v27 }
  0x1f   : > { %339 = vmatpush1.bf16.msra.mxu0 %v1011_v12  ;;  %436 = vmatpush1.bf16.msra.mxu1 %v1194_v13 }
  0x20   : > { %340 = vmatprep.subr.bf16.mxu0 %v1013_v14  ;;  %437 = vmatprep.subr.bf16.mxu1 %v1204_v15 }
  0x23   : > { %341 = vmatpush1.bf16.msra.mxu0 %v1017_v16  ;;  %438 = vmatpush1.bf16.msra.mxu1 %v1212_v17 }
  0x24   : > { %507 = vmatprep.subr.bf16.mxu0 %v997_v2  ;;  %589 = vmatprep.subr.bf16.mxu1 %v997_v2 }
  0x26   : > { %936 = vmatmul.mubr.msk.bf16.vlgmr.msra.gmra.mrb[0].mxu0 %vm330_vm1, %v1019_v20  ;;  %945 = vmatmul.mubr.msk.bf16.vlgmr.msra.gmra.mrb[0].mxu1 %vm330_vm1, %v387_v21 }
  0x27   : > { %508 = vmatpush1.bf16.msra.mxu0 %v1160_v5  ;;  %539 = vmatprep.mubr.bf16.mxu0 %v1089_v3 }
  0x28   : > { %509 = vmatprep.subr.bf16.mxu0 %v1169_v7  ;;  %590 = vmatpush1.bf16.msra.mxu1 %v1160_v5 }
  0x29   : > { %591 = vmatprep.subr.bf16.mxu1 %v1169_v7  ;;  %621 = vmatprep.mubr.bf16.mxu1 %v1089_v3 }
  0x2b   : > { %510 = vmatpush1.bf16.msra.mxu0 %v1177_v9 }
  0x2c   : > { %511 = vmatprep.subr.bf16.mxu0 %v1186_v11  ;;  %592 = vmatpush1.bf16.msra.mxu1 %v1177_v9 }
  0x2d   : > { %593 = vmatprep.subr.bf16.mxu1 %v1186_v11 }
  0x2f   : > { %512 = vmatpush1.bf16.msra.mxu0 %v1194_v13 }
  0x30   : > { %513 = vmatprep.subr.bf16.mxu0 %v1204_v15  ;;  %594 = vmatpush1.bf16.msra.mxu1 %v1194_v13 }
  0x31   : > { %595 = vmatprep.subr.bf16.mxu1 %v1204_v15 }
  0x33   : > { %514 = vmatpush1.bf16.msra.mxu0 %v1212_v17 }
  0x34   : > { %596 = vmatpush1.bf16.msra.mxu1 %v1212_v17  ;;  %664 = vmatprep.subr.bf16.mxu0 %v997_v2 }
  0x8f   : > { %v489_v51 = vpop.permute.xlu0 %488 }
  0xf9   : > { %v368_v28 = vpop.f32.mrb[0].mxu0  ;;  %v465_v29 = vpop.f32.mrb[0].mxu1 }
  0xfa   : > { %v369_v30 = vadd.f32 %v368_v28, %v278_v26  ;;  %v370_v31 = vpop.f32.mrb[1].mxu0  ;;  %v467_v32 = vpop.f32.mrb[1].mxu1 }
  0xfb   : > { %v372_v34 = vpop.f32.mrb[2].mxu0  ;;  %v469_v35 = vpop.f32.mrb[2].mxu1  ;;  %v371_v42 = vadd.f32 %v370_v31, %v282_v33 }
  0xfc   : > { %v472_v36 = vadd.f32 %v465_v29, %v369_v30  ;;  %v1240_v37 = vadd.f32 %v372_v34, %v278_v26  ;;  %v374_v38 = vpop.f32.mrb[3].mxu0  ;;  %v470_v39 = vpop.f32.mrb[3].mxu1 }
  0xfd   : > { %v1242_v40 = vadd.f32 %v374_v38, %v282_v33  ;;  %v473_v43 = vadd.f32 %v467_v32, %v371_v42 }
  0xfe   : > { %v946_v41 = vmul.f32 -1.442695, %v472_v36 }
  0xff   : > { %v947_v49 = vmul.f32 -1.442695, %v473_v43 }
 0x100   : > { %1024 = vpow2.f32 %v946_v41 }
 0x101   : > { %1026 = vtanh.f32 %v473_v43 }
 0x10a   : > { %v1025_v44 = vpop.eup %1024 }
 0x10b   : > { %v480_v45 = vadd.f32 1.0, %v1025_v44  ;;  %v1027_v46 = vpop.eup %1026 }
 0x10d   : > { %1028 = vrcp.f32 %v480_v45 }
 0x10e   : > { %1030 = vpow2.f32 %v947_v49 }
 0x117   : > { %v1029_v47 = vpop.eup %1028 }
 0x118   : > { %v492_v48 = vmul.f32 %v1029_v47, %v1027_v46  ;;  %v1031_v50 = vpop.eup %1030  ;;  %v491_v53 = vmul.f32 %v1029_v47, %v489_v51 }
 0x119   : > { %v481_v52 = vadd.f32 1.0, %v1031_v50 }
 0x11a   : > { %494 = vrot.lane.b32.xlu0 %v492_v48, %s1090_s19 }
 0x11b   : > { %1032 = vrcp.f32 %v481_v52 }
 0x125   : > { %v1033_v56 = vpop.eup %1032 }
 0x18c   : > { %v495_v54 = vpop.permute.xlu0 %494 }
 0x18d   : > { %v497_v55 = vadd.f32 %v495_v54, %v491_v53 }
 0x18f   : > { %1034 = vtanh.f32 %v497_v55 }
 0x199   : > { %v1035_v57 = vpop.eup %1034 }
 0x19a   : > { %v1245_v58 = vmul.f32 %v1035_v57, %v1033_v56 }
 0x19c   : > { %v500_v59 = vpack.c.bf16 %v1245_v58, %v1245_v58 }
 0x19e   : > { %502 = vrot.lane.b32.xlu1 %v500_v59, %s1090_s19 }
 0x210   : > { %v503_v60 = vpop.permute.xlu1 %502 }
 0x211   : > { %948 = vmatmul.mubr.msk.bf16.vlgmr.msra.gmra.mrb[4].mxu0 %vm330_vm1, %v503_v60 }
 0x212   : > { %665 = vmatpush1.bf16.msra.mxu0 %v1160_v5  ;;  %696 = vmatprep.mubr.bf16.mxu0 %v1089_v3 }
 0x213   : > { %666 = vmatprep.subr.bf16.mxu0 %v1169_v7 }
 0x216   : > { %667 = vmatpush1.bf16.msra.mxu0 %v1177_v9  ;;  %v570_v9 = vrot.slane %v497_v55, 4 }
 0x217   : > { %668 = vmatprep.subr.bf16.mxu0 %v1186_v11 }
 0x21a   : > { %669 = vmatpush1.bf16.msra.mxu0 %v1194_v13 }
 0x21b   : > { %670 = vmatprep.subr.bf16.mxu0 %v1204_v15 }
 0x21e   : > { %671 = vmatpush1.bf16.msra.mxu0 %v1212_v17 }
 0x2e4   : > { %v541_v61 = vpop.f32.mrb[4].mxu0 }
 0x2e5   : > { %v550_v62 = vrot.slane %v541_v61, 4  ;;  %v543_v63 = vpop.f32.mrb[5].mxu0 }
 0x2e6   : > { %v545_v0 = vpop.f32.mrb[6].mxu0  ;;  %v551_v3 = vrot.slane %v543_v63, 4 }
 0x2e7   : > { %v554_v1 = vadd.f32 %v550_v62, %v369_v30  ;;  %v546_v2 = vpop.f32.mrb[7].mxu0 }
 0x2e8   : > { %v555_v5 = vadd.f32 %v551_v3, %v371_v42  ;;  %v1022_v3 = vld [vmem:[%s1304_s4 + $0x10] sm:$0xff]  }
 0x2e9   : > { %v949_v4 = vmul.f32 -1.442695, %v554_v1 }
 0x2ea   : > { %v950_v13 = vmul.f32 -1.442695, %v555_v5 }
 0x2eb   : > { %1036 = vpow2.f32 %v949_v4  ;;  %v1091_v4 = vmov 0.0  }
 0x2ec   : > { %1038 = vtanh.f32 %v555_v5  ;;  %970 = vmatprep.subr.bf16.mxu1 %v1091_v4  ;;  %v1023_v5 = vld [vmem:[%s1304_s4 + $0x18] sm:$0xff]  }
 0x2f5   : > { %v1037_v6 = vpop.eup %1036 }
 0x2f6   : > { %v562_v7 = vadd.f32 1.0, %v1037_v6  ;;  %v1039_v8 = vpop.eup %1038 }
 0x2f8   : > { %1040 = vrcp.f32 %v562_v7 }
 0x2f9   : > { %1042 = vpow2.f32 %v950_v13 }
 0x302   : > { %v1041_v10 = vpop.eup %1040 }
 0x303   : > { %v573_v11 = vmul.f32 %v1041_v10, %v1039_v8  ;;  %v572_v12 = vmul.f32 %v1041_v10, %v570_v9  ;;  %v1043_v14 = vpop.eup %1042 }
 0x304   : > { %v563_v15 = vadd.f32 1.0, %v1043_v14 }
 0x305   : > { %575 = vrot.lane.b32.xlu1 %v573_v11, %s1090_s19 }
 0x306   : > { %1044 = vrcp.f32 %v563_v15 }
 0x310   : > { %v1045_v18 = vpop.eup %1044 }
 0x377   : > { %v576_v16 = vpop.permute.xlu1 %575 }
 0x378   : > { %v578_v17 = vadd.f32 %v576_v16, %v572_v12 }
 0x37a   : > { %1046 = vtanh.f32 %v578_v17  ;;  %v646_v34 = vrot.slane %v578_v17, 4 }
 0x384   : > { %v1047_v19 = vpop.eup %1046 }
 0x385   : > { %v1260_v20 = vmul.f32 %v1047_v19, %v1045_v18  ;;  %v957_v18 = vld [vmem:[%s1305_s5] ss:$0 sm:$0xff] }
 0x387   : > { %v581_v21 = vpack.c.bf16 %v1260_v20, %v1260_v20  ;;  %v750_v14 = vsel %vm749_vm3, %v1245_v58, %v1260_v20 }
 0x389   : > { %v583_v22 = vrot.slane %v581_v21, 2 }
 0x38b   : > { %584 = vrot.lane.b32.xlu0 %v583_v22, %s1090_s19 }
 0x3fd   : > { %v585_v23 = vpop.permute.xlu0 %584 }
 0x3fe   : > { %951 = vmatmul.mubr.msk.bf16.vlgmr.msra.gmra.mrb[4].mxu1 %vm330_vm1, %v585_v23 }
 0x3ff   : > { %978 = vmatprep.mubr.msk.bf16.mxu1 %vm1092_vm2, %v1091_v4 }
 0x4d1   : > { %v623_v24 = vpop.f32.mrb[4].mxu1 }
 0x4d2   : > { %v630_v25 = vadd.f32 %v623_v24, %v1240_v37  ;;  %v625_v26 = vpop.f32.mrb[5].mxu1 }
 0x4d3   : > { %v627_v27 = vpop.f32.mrb[6].mxu1  ;;  %v631_v30 = vadd.f32 %v625_v26, %v1242_v40 }
 0x4d4   : > { %v952_v28 = vmul.f32 -1.442695, %v630_v25  ;;  %v628_v29 = vpop.f32.mrb[7].mxu1 }
 0x4d5   : > { %v953_v39 = vmul.f32 -1.442695, %v631_v30 }
 0x4d6   : > { %1048 = vpow2.f32 %v952_v28 }
 0x4d7   : > { %1050 = vtanh.f32 %v631_v30 }
 0x4e0   : > { %v1049_v31 = vpop.eup %1048 }
 0x4e1   : > { %v638_v32 = vadd.f32 1.0, %v1049_v31  ;;  %v1051_v33 = vpop.eup %1050 }
 0x4e3   : > { %1052 = vrcp.f32 %v638_v32 }
 0x4e4   : > { %1054 = vpow2.f32 %v953_v39 }
 0x4ed   : > { %v1053_v35 = vpop.eup %1052 }
 0x4ee   : > { %v649_v36 = vmul.f32 %v1053_v35, %v1051_v33  ;;  %v648_v38 = vmul.f32 %v1053_v35, %v646_v34  ;;  %v1055_v41 = vpop.eup %1054 }
 0x4ef   : > { %v639_v42 = vadd.f32 1.0, %v1055_v41 }
 0x4f0   : > { %651 = vrot.lane.b32.xlu1 %v649_v36, %s1090_s19 }
 0x4f1   : > { %1056 = vrcp.f32 %v639_v42 }
 0x4fb   : > { %v1057_v45 = vpop.eup %1056 }
 0x562   : > { %v652_v43 = vpop.permute.xlu1 %651 }
 0x563   : > { %v654_v44 = vadd.f32 %v652_v43, %v648_v38 }
 0x565   : > { %1058 = vtanh.f32 %v654_v44  ;;  %v727_v63 = vrot.slane %v654_v44, 4 }
 0x56f   : > { %v1059_v46 = vpop.eup %1058 }
 0x570   : > { %v656_v47 = vmul.f32 %v1059_v46, %v1057_v45 }
 0x572   : > { %v657_v48 = vpack.c.bf16 %v656_v47, %v656_v47 }
 0x574   : > { %659 = vrot.lane.b32.xlu0 %v657_v48, %s1090_s19 }
 0x5e6   : > { %v660_v49 = vpop.permute.xlu0 %659 }
 0x5e7   : > { %954 = vmatmul.mubr.msk.bf16.vlgmr.msra.gmra.mrb[8].mxu0 %vm330_vm1, %v660_v49 }
 0x6ba   : > { %v698_v50 = vpop.f32.mrb[8].mxu0 }
 0x6bb   : > { %v707_v51 = vrot.slane %v698_v50, 4  ;;  %v700_v52 = vpop.f32.mrb[9].mxu0 }
 0x6bc   : > { %v702_v53 = vpop.f32.mrb[10].mxu0  ;;  %v708_v57 = vrot.slane %v700_v52, 4 }
 0x6bd   : > { %v711_v54 = vadd.f32 %v707_v51, %v1240_v37  ;;  %v703_v55 = vpop.f32.mrb[11].mxu0  ;;  %v1020_v37 = vld [vmem:[%s1304_s4] sm:$0xff]  }
 0x6be   : > { %v712_v59 = vadd.f32 %v708_v57, %v1242_v40  ;;  %971 = vmatpush3.bf16.msra.mxu1 %v1020_v37  ;;  %v1021_v40 = vld [vmem:[%s1304_s4 + $0x8] sm:$0xff]  }
 0x6bf   : > { %v955_v56 = vmul.f32 -1.442695, %v711_v54  ;;  %972 = vmatprep.subr.bf16.mxu1 %v1091_v4 }
 0x6c0   : > { %v956_v6 = vmul.f32 -1.442695, %v712_v59 }
 0x6c1   : > { %1060 = vpow2.f32 %v955_v56 }
 0x6c2   : > { %1062 = vtanh.f32 %v712_v59  ;;  %973 = vmatpush3.bf16.msra.mxu1 %v1021_v40 }
 0x6c3   : > { %974 = vmatprep.subr.bf16.mxu1 %v1091_v4 }
 0x6c6   : > { %975 = vmatpush3.bf16.msra.mxu1 %v1022_v3 }
 0x6c7   : > { %976 = vmatprep.subr.bf16.mxu1 %v1091_v4 }
 0x6ca   : > { %977 = vmatpush3.bf16.msra.mxu1 %v1023_v5 }
 0x6cb   : > { %v1061_v60 = vpop.eup %1060 }
 0x6cc   : > { %v719_v61 = vadd.f32 1.0, %v1061_v60  ;;  %v1063_v62 = vpop.eup %1062 }
 0x6ce   : > { %1064 = vrcp.f32 %v719_v61 }
 0x6cf   : > { %1066 = vpow2.f32 %v956_v6 }
 0x6d8   : > { %v1065_v0 = vpop.eup %1064 }
 0x6d9   : > { %v730_v1 = vmul.f32 %v1065_v0, %v1063_v62  ;;  %v729_v2 = vmul.f32 %v1065_v0, %v727_v63  ;;  %v1067_v7 = vpop.eup %1066 }
 0x6da   : > { %v720_v8 = vadd.f32 1.0, %v1067_v7 }
 0x6db   : > { %732 = vrot.lane.b32.xlu1 %v730_v1, %s1090_s19 }
 0x6dc   : > { %1068 = vrcp.f32 %v720_v8 }
 0x6e6   : > { %v1069_v11 = vpop.eup %1068 }
 0x74d   : > { %v733_v9 = vpop.permute.xlu1 %732 }
 0x74e   : > { %v735_v10 = vadd.f32 %v733_v9, %v729_v2 }
 0x750   : > { %1070 = vtanh.f32 %v735_v10 }
 0x75a   : > { %v1071_v12 = vpop.eup %1070 }
 0x75b   : > { %v737_v13 = vmul.f32 %v1071_v12, %v1069_v11 }
 0x75d   : > { %v751_v15 = vsel %vm749_vm3, %v656_v47, %v737_v13 }
 0x75e   : > { %v752_v16 = vpack.c.bf16 %v751_v15, %v750_v14 }
 0x760   : > { %769 = vrot.lane.b32.xlu0 %v752_v16, %s1090_s19 }
 0x7d2   : > { %v770_v17 = vpop.permute.xlu0 %769 }
 0x7d3   : > { %979 = vmatmul.mubr.msk.bf16.vlgmr.msra.gmra.mrb[8].mxu1 %vm330_vm1, %v770_v17 }
 0x8a6   : > { %v832_v19 = vpop.f32.mrb[8].mxu1 }
 0x8a7   : > { %v833_v21 = vadd.f32 %v957_v18, %v832_v19  ;;  %v980_v22 = vpop.f32.mrb[9].mxu1 }
 0x8a8   : > { %v835_v23 = vpop.f32.mrb[10].mxu1 }
 0x8a9   : > { %v836_v24 = vadd.f32 %v957_v18, %v835_v23  ;;  %839 = vmax.xlane.f32.xlu1 %v833_v21  ;;  %v981_v25 = vpop.f32.mrb[11].mxu1 }
 0x8ab   : > { %841 = vmax.xlane.f32.xlu0 %v836_v24 }
 0x936   : > { %v840_v58 = vpop.xlane.xlu1 %839 }
 0x937   : > { %v843_v20 = vsub.f32 %v833_v21, %v840_v58 }
 0x938   : > { %v842_v26 = vpop.xlane.xlu0 %841 }
 0x939   : > { %v845_v27 = vmul.f32 1.442695, %v843_v20  ;;  %v844_v28 = vsub.f32 %v836_v24, %v842_v26 }
 0x93b   : > { %1072 = vpow2.f32 %v845_v27  ;;  %v847_v29 = vmul.f32 1.442695, %v844_v28 }
 0x93d   : > { %1074 = vpow2.f32 %v847_v29 }
 0x945   : > { %v1073_v30 = vpop.eup %1072 }
 0x946   : > { %849 = vadd.xlane.f32.xlu0 %v1073_v30 }
 0x947   : > { %v1075_v31 = vpop.eup %1074 }
 0x948   : > { %851 = vadd.xlane.f32.xlu1 %v1075_v31 }
 0x959   : > { %745 = vrot.lane.b32.xlu1 %v735_v10, %s1090_s19 }
 0x95c   : > { %739 = vrot.lane.b32.xlu0 %v737_v13, %s1090_s19 }
 0x9d3   : > { %v850_v32 = vpop.xlane.xlu0 %849 }
 0x9d4   : > { %1076 = vlog2.f32 %v850_v32 }
 0x9d5   : > { %v852_v33 = vpop.xlane.xlu1 %851 }
 0x9d6   : > { %1078 = vlog2.f32 %v852_v33 }
 0x9d7   : > { %v740_v34 = vpop.permute.xlu0 %739 }
 0x9d8   : > { %743 = vst.msk [vmem:[#allocation2 - $0x4] sm:$0xf0] %vm742_vm4, %v740_v34 }
 0x9d9   : > { %v746_v35 = vpop.permute.xlu1 %745 }
 0x9da   : > { %748 = vst.msk [vmem:[#allocation3 - $0x4] sm:$0xf0] %vm742_vm4, %v746_v35 }
 0x9de   : > { %v1077_v36 = vpop.eup %1076 }
 0x9df   : > { %v854_v38 = vmul.f32 0.6931472, %v1077_v36 }
 0x9e0   : > { %v1079_v39 = vpop.eup %1078 }
 0x9e1   : > { %v857_v41 = vsub.f32 %v843_v20, %v854_v38  ;;  %v856_v42 = vmul.f32 0.6931472, %v1079_v39 }
 0x9e3   : > { %859 = vst [vmem:[%s1144_s7] sm:$0xff] %v857_v41  ;;  %v858_v43 = vsub.f32 %v844_v28, %v856_v42 }
 0x9e5   : > { %860 = vst [vmem:[%s1144_s7 + $0x8] sm:$0xff] %v858_v43 }
 0x9e6 PF: > { %s16_s21 = sadd.s32 1, %s1086_s21  }
 0x9e7   : > { %p13_p5 = scmp.ge.s32.totalorder %s16_s21, 4  }
 0x9e9   :  { %15 = sbr.rel (!%p13_p5) target bundleno = 1 (0x1), region = 78 }

</bundles_post_ra>
